<compile_context>
chip_gen: v7x
topology: tpu7x:2x2x1
jax: 0.10.0
libtpu: 0.0.40
codegen_flags: <defaults>
</compile_context>

<pallas_src>
import jax
import jax.numpy as jnp
from jax.experimental import pallas as pl
from jax.experimental.pallas import tpu as pltpu

LANES = 128                       # vreg lane width
SUBLANES = 8                      # vreg sublane count
MAX_TILE_BYTES = 4 * 1024 * 1024  # per-input, per-pipeline-step DMA target
NCORES = 2                        # v7x has 2 TensorCores; harmless elsewhere
MIN_ROWS_FOR_SPLIT = 1024         # don't bother splitting tiny problems


def _round_up(x, m):
    return ((x + m - 1) // m) * m


def _make_rmse_partial_kernel(rows, tm, steps, any_mask):
    """Per-core partial sum-of-squared-differences kernel."""

    def kernel(p_ref, t_ref, o_ref):
        c = pl.program_id(0)          # core axis ("parallel")
        i = pl.program_id(1)          # reduction axis ("arbitrary")

        @pl.when(i == 0)
        def _init():
            o_ref[...] = jnp.zeros_like(o_ref)

        # Cast in-kernel (free on the VPU); HBM traffic stays at native width.
        d = p_ref[...].astype(jnp.float32) - t_ref[...].astype(jnp.float32)
        d2 = d * d

        def accumulate(x):
            # (tm, 128) -> (tm//8, 8, 128), sum over the leading axis: pure
            # VPU adds folded into a tiny (8, 128) resident output block.
            o_ref[...] += jnp.sum(
                x.reshape(tm // SUBLANES, SUBLANES, LANES), axis=0)

        if any_mask:
            t_idx = c * steps + i               # logical (unclamped) tile index

            # Interior tiles: unmasked fast path.
            @pl.when((t_idx + 1) * tm <= rows)
            def _full():
                accumulate(d2)

            # Boundary / clamped tiles: mask garbage rows past the logical end.
            @pl.when((t_idx + 1) * tm > rows)
            def _partial():
                ridx = t_idx * tm + jax.lax.broadcasted_iota(
                    jnp.int32, (tm, LANES), 0)
                accumulate(jnp.where(ridx < rows, d2, jnp.float32(0.0)))
        else:
            accumulate(d2)

    return kernel


def rmse_loss(predictions, targets):
    assert predictions.shape == targets.shape, "shape mismatch"
    n = predictions.size
    assert n > 0

    p = predictions.reshape(-1)
    t = targets.reshape(-1)

    # Common ML case: n % 128 == 0 -> pure metadata reshape, no HBM copy.
    # Rare ragged case zero-pads (padded diff contributes exactly 0).
    # TODO(synk): ragged sizes could avoid this copy with a flat-index mask on
    # a 1-D block, but the layout cost/benefit is not worth it here.
    if n % LANES != 0:
        padded = pl.cdiv(n, LANES) * LANES
        p = jnp.pad(p, (0, padded - n))
        t = jnp.pad(t, (0, padded - n))
    rows = p.size // LANES
    p = p.reshape(rows, LANES)
    t = t.reshape(rows, LANES)

    # Sub-8-row inputs: pad to one full sublane tile (<= 7*128 elems, trivial).
    if rows < SUBLANES:
        pad_rows = SUBLANES - rows
        p = jnp.pad(p, ((0, pad_rows), (0, 0)))
        t = jnp.pad(t, ((0, pad_rows), (0, 0)))
        rows = SUBLANES

    # ---- tiling -----------------------------------------------------------
    ncores = NCORES if rows >= MIN_ROWS_FOR_SPLIT else 1
    itemsize = jnp.dtype(p.dtype).itemsize
    # dtype-scaled row cap so each pipeline step moves ~MAX_TILE_BYTES / input
    dtype_cap = max(SUBLANES,
                    (MAX_TILE_BYTES // (LANES * itemsize)) // SUBLANES * SUBLANES)
    tm_cap = min(dtype_cap, (rows // SUBLANES) * SUBLANES)
    rpc = pl.cdiv(rows, ncores)               # logical rows per core
    steps = max(1, pl.cdiv(rpc, tm_cap))      # tiles per core
    # balanced tile size: avoids a nearly-empty trailing tile for unlucky sizes
    tm = min(tm_cap, _round_up(pl.cdiv(rpc, steps), SUBLANES))

    coverage = ncores * steps * tm
    any_mask = coverage != rows
    last_tile = (rows - 1) // tm
    need_clamp = (ncores * steps - 1) > last_tile   # keep every DMA in bounds

    def in_map(c, i):
        t_idx = c * steps + i
        if need_clamp:
            t_idx = jnp.minimum(t_idx, last_tile)
        return (t_idx, 0)

    kernel = _make_rmse_partial_kernel(rows, tm, steps, any_mask)

    vmem_bytes = (
        2 * 2 * tm * LANES * itemsize            # 2 inputs x double buffer
        + 2 * SUBLANES * LANES * 4               # output partial (double buffer)
    )

    partials = pl.pallas_call(
        kernel,
        out_shape=jax.ShapeDtypeStruct((ncores * SUBLANES, LANES), jnp.float32),
        grid_spec=pltpu.PrefetchScalarGridSpec(
            num_scalar_prefetch=0,
            grid=(ncores, steps),
            in_specs=[
                pl.BlockSpec((tm, LANES), in_map),
                pl.BlockSpec((tm, LANES), in_map),
            ],
            out_specs=pl.BlockSpec((SUBLANES, LANES), lambda c, i: (c, 0)),
        ),
        compiler_params=pltpu.CompilerParams(
            dimension_semantics=("parallel", "arbitrary"),
            vmem_limit_bytes=int(max(vmem_bytes + (8 << 20), 32 << 20)),
        ),
        cost_estimate=pl.CostEstimate(
            flops=3 * n,
            transcendentals=0,
            bytes_accessed=2 * n * itemsize + ncores * SUBLANES * LANES * 4,
        ),
    )(p, t)

    # Tiny XLA epilogue: combine per-core partials, mean + eps, sqrt.
    total = jnp.sum(partials, dtype=jnp.float32)
    return jnp.sqrt(total / jnp.float32(n) + jnp.float32(1e-6))


def _ref_loss(p, t):
    return jnp.sqrt(
        jnp.mean((p.astype(jnp.float32) - t.astype(jnp.float32)) ** 2) + 1e-6)


if __name__ == "__main__":
    key = jax.random.PRNGKey(0)
    kp, kt = jax.random.split(key)

    # Primary small shape (regression-head style NCHW tensor).
    shape = (2, 4, 16, 16)
    preds = jax.random.normal(kp, shape, dtype=jnp.float32)
    targs = jax.random.normal(kt, shape, dtype=jnp.float32)
    loss = rmse_loss(preds, targs)
    jax.block_until_ready(loss)
    ref = _ref_loss(preds, targs)
    assert jnp.allclose(loss, ref, rtol=1e-4, atol=1e-6), (loss, ref)

    # Exercise the dual-core split + boundary-mask path.
    shape2 = (4, 3, 128, 129)
    p2 = jax.random.normal(kp, shape2, dtype=jnp.float32)
    t2 = jax.random.normal(kt, shape2, dtype=jnp.float32)
    loss2 = rmse_loss(p2, t2)
    jax.block_until_ready(loss2)
    ref2 = _ref_loss(p2, t2)
    assert jnp.allclose(loss2, ref2, rtol=1e-4, atol=1e-6), (loss2, ref2)

    # Exercise the ragged (n % 128 != 0), tiny-row fallback path.
    shape3 = (5, 7, 13)
    p3 = jax.random.normal(kp, shape3, dtype=jnp.float32)
    t3 = jax.random.normal(kt, shape3, dtype=jnp.float32)
    loss3 = rmse_loss(p3, t3)
    jax.block_until_ready(loss3)
    ref3 = _ref_loss(p3, t3)
    assert jnp.allclose(loss3, ref3, rtol=1e-4, atol=1e-6), (loss3, ref3)

    print("KERNEL_OK")
</pallas_src>

<mosaic_0001>
module attributes {stable_mosaic.version = 11 : i64} {
  func.func @kernel(%arg0: i32, %arg1: i32, %arg2: memref<16x128xf32, #tpu.memory_space<vmem>>, %arg3: memref<16x128xf32, #tpu.memory_space<vmem>>, %arg4: memref<8x128xf32, #tpu.memory_space<vmem>>) attributes {dimension_semantics = [#tpu.dimension_semantics<parallel>, #tpu.dimension_semantics<arbitrary>], iteration_bounds = array<i64: 1, 1>, scalar_prefetch = 0 : i64, scratch_operands = 0 : i64, tpu.core_type = #tpu.core_type<tc>, window_params = [{transform_indices = @transform_0, window_bounds = array<i64: 16, 128>}, {transform_indices = @transform_1, window_bounds = array<i64: 16, 128>}, {transform_indices = @transform_2, window_bounds = array<i64: 8, 128>}]} {
    %c0_i32 = arith.constant 0 : i32
    %0 = arith.cmpi eq, %arg1, %c0_i32 : i32
    %1 = arith.extui %0 : i1 to i32
    %c0_i32_0 = arith.constant 0 : i32
    %2 = arith.cmpi ne, %1, %c0_i32_0 : i32
    scf.if %2 {
      %cst_8 = arith.constant 0.000000e+00 : f32
      %12 = vector.broadcast %cst_8 : f32 to vector<8x128xf32>
      %c0_9 = arith.constant 0 : index
      %c0_10 = arith.constant 0 : index
      %13 = vector.load %arg4[%c0_9, %c0_10] : memref<8x128xf32, #tpu.memory_space<vmem>>, vector<8x128xf32>
      tpu.vector_store %arg4[%c0_9, %c0_10], %12 {strides = array<i32>} : memref<8x128xf32, #tpu.memory_space<vmem>>, vector<8x128xf32>,
    } else {
    }
    %c0 = arith.constant 0 : index
    %c0_1 = arith.constant 0 : index
    %3 = vector.load %arg2[%c0, %c0_1] : memref<16x128xf32, #tpu.memory_space<vmem>>, vector<16x128xf32>
    %c0_2 = arith.constant 0 : index
    %c0_3 = arith.constant 0 : index
    %4 = vector.load %arg3[%c0_2, %c0_3] : memref<16x128xf32, #tpu.memory_space<vmem>>, vector<16x128xf32>
    %5 = arith.subf %3, %4 : vector<16x128xf32>
    %6 = arith.mulf %5, %5 : vector<16x128xf32>
    %c0_4 = arith.constant 0 : index
    %c0_5 = arith.constant 0 : index
    %7 = vector.load %arg4[%c0_4, %c0_5] : memref<8x128xf32, #tpu.memory_space<vmem>>, vector<8x128xf32>
    %8 = vector.shape_cast %6 : vector<16x128xf32> to vector<2x8x128xf32>
    %cst = arith.constant dense<0.000000e+00> : vector<8x128xf32>
    %9 = vector.multi_reduction <add>, %8, %cst [0] : vector<2x8x128xf32> to vector<8x128xf32>
    %10 = arith.addf %7, %9 : vector<8x128xf32>
    %c0_6 = arith.constant 0 : index
    %c0_7 = arith.constant 0 : index
    %11 = vector.load %arg4[%c0_6, %c0_7] : memref<8x128xf32, #tpu.memory_space<vmem>>, vector<8x128xf32>
    tpu.vector_store %arg4[%c0_6, %c0_7], %10 {strides = array<i32>} : memref<8x128xf32, #tpu.memory_space<vmem>>, vector<8x128xf32>,
    return
  }
  func.func @transform_0(%arg0: i32, %arg1: i32) -> (i32, i32) {
    %c1_i32 = arith.constant 1 : i32
    %0 = arith.muli %arg0, %c1_i32 : i32
    %1 = arith.addi %0, %arg1 : i32
    %c0_i32 = arith.constant 0 : i32
    %c0_i32_0 = arith.constant 0 : i32
    return %1, %c0_i32 : i32, i32
  }
  func.func @transform_1(%arg0: i32, %arg1: i32) -> (i32, i32) {
    %c1_i32 = arith.constant 1 : i32
    %0 = arith.muli %arg0, %c1_i32 : i32
    %1 = arith.addi %0, %arg1 : i32
    %c0_i32 = arith.constant 0 : i32
    %c0_i32_0 = arith.constant 0 : i32
    return %1, %c0_i32 : i32, i32
  }
  func.func @transform_2(%arg0: i32, %arg1: i32) -> (i32, i32) {
    %c0_i32 = arith.constant 0 : i32
    %c0_i32_0 = arith.constant 0 : i32
    return %arg0, %c0_i32 : i32, i32
  }
}

</mosaic_0001>

<bundles_post_ra>
// kernel: tpu_custom_call.1
= control target key start
LH: loop header
LB: loop body
LE: loop exit
PB: predicated region body
PF: predicated region fallthrough
CT: control target
= control target key end

     0   :  { %7 = vsyncpa [#allocation3], 0  ;;  %s219_s0 = inlined_call_operand.hbm [shape: f32[16,128], index: 0, kind: input, shape index: {}]   ;;  %s220_s1 = inlined_call_operand.hbm [shape: f32[16,128], index: 1, kind: input, shape index: {}]   ;;  %s221_s2 = inlined_call_operand.hbm [shape: f32[8,128], index: 2, kind: output, shape index: {}]  }
   0x1   :  { %8 = vsyncpa [#allocation6], 0 }
   0x2   :  { %9 = vsyncpa [#allocation4], 0  ;;  %s163_s9 = smov [#allocation2]   ;;  %s91_s13 = scalar_lea.hbm %s219_s0, 256 }
   0x3   :  { %s19_s10 = sshll.u32 %s163_s9, 4  ;;  %p92_p0 = scmp.ne.s32.totalorder %s219_s0, %s91_s13  ;;  %s20_s10 = int_to_ptr.vmem [resolvable:$true] %s19_s10 }
   0x4   :  { %p95_p1 = scmp.lt.u32.totalorder %s91_s13, %s219_s0 }
   0x6   :  { %p97_p2 = pnand %p95_p1, %p92_p0 }
   0x8   :  { %100 = shalt.err (!%p97_p2)
}
   0x9   :  { %s101_s18 = scalar_lea.vmem %s20_s10, 256  ;;  %p106_p4 = scmp.lt.s32.totalorder %s20_s10, %s20_s10 }
   0xa   :  { %p102_p3 = scmp.ne.s32.totalorder %s20_s10, %s101_s18  ;;  %p107_p5 = scmp.lt.s32.totalorder %s101_s18, %s101_s18 }
   0xc   :  { %p108_p6 = por %p107_p5, %p106_p4 }
   0xe   :  { %p109_p7 = pnand %p108_p6, %p102_p3 }
  0x10   :  { %112 = shalt.err (!%p109_p7)
}
  0x11   :  { %s164_s19 = smov 128   ;;  %s165_s20 = smov 8  }
  0x12   :  { %25 = dma.hbm_to_vmem [thread:$0]  %s219_s0, 256, %s20_s10, [#allocation3], %s164_s19, %s164_s19, %s165_s20  }
  0x13   :  { %s166_s23 = smov [#allocation5]   ;;  %s113_s27 = scalar_lea.hbm %s220_s1, 256 }
  0x14   :  { %s35_s24 = sshll.u32 %s166_s23, 4  ;;  %p114_p8 = scmp.ne.s32.totalorder %s220_s1, %s113_s27  ;;  %s36_s24 = int_to_ptr.vmem [resolvable:$true] %s35_s24 }
  0x15   :  { %p117_p9 = scmp.lt.u32.totalorder %s113_s27, %s220_s1 }
  0x17   :  { %p119_p10 = pnand %p117_p9, %p114_p8 }
  0x19   :  { %122 = shalt.err (!%p119_p10)
}
  0x1a   :  { %s123_s4 = scalar_lea.vmem %s36_s24, 256  ;;  %p128_p12 = scmp.lt.s32.totalorder %s36_s24, %s36_s24 }
  0x1b   :  { %p124_p11 = scmp.ne.s32.totalorder %s36_s24, %s123_s4  ;;  %p129_p13 = scmp.lt.s32.totalorder %s123_s4, %s123_s4 }
  0x1d   :  { %p130_p0 = por %p129_p13, %p128_p12 }
  0x1f   :  { %p131_p1 = pnand %p130_p0, %p124_p11 }
  0x21   :  { %134 = shalt.err (!%p131_p1)
}
  0x22   :  { %41 = dma.hbm_to_vmem [thread:$0]  %s220_s1, 256, %s36_s24, [#allocation6], %s164_s19, %s164_s19, %s165_s20  }
  0x23   :  { %157 = dma.done.wait [#allocation3], 256  }
  0x24   :  { %158 = vsyncadd [#allocation3], 4294967040 }
  0x25   :  { %159 = dma.done.wait [#allocation6], 256  }
  0x26   :  { %160 = vsyncadd [#allocation6], 4294967040  ;;  %v57_v0 = vld [vmem:[#allocation2] sm:$0xff]  ;;  %v58_v1 = vld [vmem:[#allocation2 + $0x8] sm:$0xff]  ;;  %s167_s6 = smov [#allocation7]  }
  0x27   :  { %v59_v2 = vld [vmem:[#allocation5] sm:$0xff]  ;;  %v60_v3 = vld [vmem:[#allocation5 + $0x8] sm:$0xff]  ;;  %s75_s7 = sshll.u32 %s167_s6, 4  ;;  %s76_s7 = int_to_ptr.vmem [resolvable:$true] %s75_s7 }
  0x28   :  { %v61_v4 = vsub.f32 %v57_v0, %v59_v2  ;;  %v62_v5 = vsub.f32 %v58_v1, %v60_v3  ;;  %s135_s8 = scalar_lea.vmem %s76_s7, 128  ;;  %p140_p3 = scmp.lt.s32.totalorder %s76_s7, %s76_s7 }
  0x29   :  { %p136_p2 = scmp.ne.s32.totalorder %s76_s7, %s135_s8  ;;  %p141_p4 = scmp.lt.s32.totalorder %s135_s8, %s135_s8 }
  0x2a   :  { %v63_v6 = vmul.f32 %v61_v4, %v61_v4  ;;  %v64_v7 = vmul.f32 %v62_v5, %v62_v5 }
  0x2b   :  { %p142_p5 = por %p141_p4, %p140_p3 }
  0x2c   :  { %v66_v8 = vadd.f32 %v64_v7, %v63_v6 }
  0x2d   :  { %p143_p6 = pnand %p142_p5, %p136_p2 }
  0x2e   :  { %68 = vst [vmem:[#allocation7] sm:$0xff] %v66_v8 }
  0x2f   :  { %146 = shalt.err (!%p143_p6)
}
  0x30   :  { %s147_s10 = scalar_lea.hbm %s221_s2, 128 }
  0x31   :  { %p148_p7 = scmp.ne.s32.totalorder %s221_s2, %s147_s10  ;;  %p151_p8 = scmp.lt.u32.totalorder %s147_s10, %s221_s2 }
  0x33   :  { %p153_p9 = pnand %p151_p8, %p148_p7 }
  0x35   :  { %156 = shalt.err (!%p153_p9)
}
  0x36   :  { %78 = dma.vmem_to_hbm [thread:$0]  %s76_s7, 128, %s221_s2, [#allocation4]  }
  0x37   :  { %161 = dma.done.wait [#allocation4], 128  }
  0x38   :  { %162 = vsyncadd [#allocation4], 4294967168 }
  0x39   :  { %82 = vsyncpa [#allocation3], 1 }
  0x3a   :  { %83 = vsyncpa [#allocation6], 1 }
  0x3b   :  { %84 = vsyncpa [#allocation4], 1 }

</bundles_post_ra>
